<compile_context>
chip_gen: v7x
topology: tpu7x:2x2x1
jax: 0.10.0
libtpu: 0.0.40
codegen_flags: <defaults>
</compile_context>

<pallas_src>
import functools

import jax
import jax.numpy as jnp
from jax.experimental import pallas as pl
from jax.experimental.pallas import tpu as pltpu


# ----------------------------------------------------------------------------
# Hardware / sizing helpers
# ----------------------------------------------------------------------------
def _ru(a, b):
    return ((a + b - 1) // b) * b


def _sublane_pack(itemsize):
    # Rows per packed sublane tile: 8 for f32, 16 for bf16, 32 for int8/fp8.
    return max(8, 32 // max(int(itemsize), 1))


def _tpu_generation_info():
    """(num_tensorcores, physical VMEM bytes) with conservative fallbacks."""
    cores, vmem_phys = 1, 64 << 20          # conservative (v7x-sized) fallbacks
    try:
        info = pltpu.get_tpu_info()
        v = getattr(info, "vmem_capacity_bytes", None)
        if v:
            vmem_phys = int(v)
        for attr in ("num_cores", "num_tensorcores", "tensorcore_count", "core_count"):
            nv = getattr(info, attr, None)
            if isinstance(nv, int) and nv > 0:
                cores = nv
                break
    except Exception:
        pass
    if cores <= 1:
        try:
            kind = (jax.devices()[0].device_kind or "").lower()
            # Megacore parts (2 TensorCores / chip): v4, v5p, v7x.
            if any(tag in kind for tag in ("v4", "v5p", "v7")):
                cores = 2
        except Exception:
            pass
    return cores, int(vmem_phys)


def _vmem_cap(vmem_phys):
    # ~56 MiB usable on v7x (64 MiB physical), ~104 MiB on 128 MiB parts.
    return int(min(max(32 << 20, vmem_phys - (8 << 20)), 104 << 20))


def _vmem_limit(need, vmem_phys):
    cap = _vmem_cap(vmem_phys)
    limit = min(max(need + (16 << 20), 32 << 20), cap)
    # Never declare less than the computed footprint.
    return int(max(limit, need + (2 << 20)))


def _feature_tile(f, itemsize, pack, target_bytes):
    """Lane tile over F = C*H*W: full F when it fits, else a 128-multiple divisor."""
    if f * itemsize * pack <= target_bytes or f <= 128:
        return f
    cap = max(128, target_bytes // (pack * itemsize))
    best = None
    for tf in range(128, min(f, cap) + 1, 128):
        if f % tf == 0:
            best = tf
    if best is not None:
        return best
    # TODO(synk): no lane-aligned divisor under the budget; fall back to the full
    # feature axis (rows-per-block shrinks to the sublane pack instead).
    return f


def _row_tile(m1, bytes_per_row, pack, nsplit, target_bytes):
    """Rows of (T*N) per block; prefer an exact (maskless) tiling near the target."""
    cap = target_bytes // max(bytes_per_row, 1)
    cap = min(cap, m1)
    cap = (cap // pack) * pack
    if cap < pack:
        return pack if m1 >= pack else m1
    lo = max(pack, cap // 2)
    for tm in range(cap, lo - 1, -pack):
        if m1 % (nsplit * tm) == 0:
            return tm            # exact tiling: no ragged tail, no masking
    return cap                   # ragged tail handled with tail-only masking


# ----------------------------------------------------------------------------
# Kernel 1: per-feature (lane) sum and sum-of-squares over rows of (M1, F).
# ----------------------------------------------------------------------------
def _reduce_kernel(x_ref, part_s_ref, part_q_ref, acc_s, acc_q, *,
                   m1, tm, nt, sub, tail_mask):
    s = pl.program_id(0)          # TensorCore split (parallel)
    t = pl.program_id(2)          # row-reduction axis (innermost, "arbitrary")

    @pl.when(t == 0)
    def _init():
        acc_s[...] = jnp.zeros_like(acc_s)
        acc_q[...] = jnp.zeros_like(acc_q)

    x = x_ref[...].astype(jnp.float32)                      # (tm, tf)

    def _accumulate(xv):
        if sub == 8:
            # Sublane-split view; leading-axis sum == pure VPU adds.
            xr = xv.reshape(tm // 8, 8, xv.shape[-1])
            acc_s[...] += jnp.sum(xr, axis=0)
            acc_q[...] += jnp.sum(xr * xr, axis=0)
        else:
            acc_s[...] += jnp.sum(xv, axis=0, keepdims=True)
            acc_q[...] += jnp.sum(xv * xv, axis=0, keepdims=True)

    if tail_mask:
        # Mask only the tail / overhang block; interior blocks take the
        # unmasked fast path (no per-element iota / compare / select).
        is_tail = (s * nt + t) * tm + tm > m1

        @pl.when(jnp.logical_not(is_tail))
        def _interior():
            _accumulate(x)

        @pl.when(is_tail)
        def _tail():
            base = (s * nt + t) * tm
            row = base + jax.lax.broadcasted_iota(jnp.int32, (tm, 1), 0)
            _accumulate(jnp.where(row < m1, x, 0.0))
    else:
        _accumulate(x)

    @pl.when(t == nt - 1)
    def _flush():
        part_s_ref[...] = acc_s[...][None]
        part_q_ref[...] = acc_q[...][None]


def _channel_sums(x2, c, hw, *, target_bytes, cores, vmem_phys):
    """Per-channel sum and sum-of-squares of the (M1, C*HW) slab."""
    m1, f = x2.shape
    itemsize = jnp.dtype(x2.dtype).itemsize
    pack = _sublane_pack(itemsize)

    tf = _feature_tile(f, itemsize, pack, target_bytes)
    nf = f // tf

    # Split the row range across TensorCores only on multi-TC chips.
    nsplit = 2 if (cores >= 2 and m1 >= 2 * pack) else 1
    tm = _row_tile(m1, tf * itemsize, pack, nsplit, target_bytes)
    nb = pl.cdiv(m1, tm)
    nsplit = min(nsplit, nb)
    nt = pl.cdiv(nb, nsplit)
    tail_mask = (nsplit * nt * tm != m1)
    sub = 8 if tm % 8 == 0 else 1

    kern = functools.partial(_reduce_kernel, m1=m1, tm=tm, nt=nt, sub=sub,
                             tail_mask=tail_mask)

    tm_p, tf_p = _ru(tm, 8), _ru(tf, 128)
    need = (2 * tm_p * tf_p * itemsize           # double-buffered input blocks
            + 3 * tm_p * tf_p * 4                # f32 upcast + x*x temporaries
            + 6 * _ru(sub, 8) * tf_p * 4         # accumulators + partial outputs
            + (2 << 20))

    parts_s, parts_q = pl.pallas_call(
        kern,
        out_shape=(jax.ShapeDtypeStruct((nsplit, sub, f), jnp.float32),
                   jax.ShapeDtypeStruct((nsplit, sub, f), jnp.float32)),
        grid_spec=pltpu.PrefetchScalarGridSpec(
            num_scalar_prefetch=0,
            grid=(nsplit, nf, nt),
            in_specs=[pl.BlockSpec(
                (tm, tf),
                lambda s, ff, t: (jnp.minimum(s * nt + t, nb - 1), ff))],
            out_specs=(pl.BlockSpec((1, sub, tf), lambda s, ff, t: (s, 0, ff)),
                       pl.BlockSpec((1, sub, tf), lambda s, ff, t: (s, 0, ff))),
            scratch_shapes=[pltpu.VMEM((sub, tf), jnp.float32),
                            pltpu.VMEM((sub, tf), jnp.float32)]),
        compiler_params=pltpu.CompilerParams(
            dimension_semantics=("parallel", "parallel", "arbitrary"),
            vmem_limit_bytes=_vmem_limit(need, vmem_phys)),
    )(x2)

    # O(F) glue: fold the tiny partials and segment-reduce per channel.
    ssum = parts_s.sum(axis=(0, 1)).reshape(c, hw).sum(axis=-1)
    ssq = parts_q.sum(axis=(0, 1)).reshape(c, hw).sum(axis=-1)
    return ssum, ssq


# ----------------------------------------------------------------------------
# Kernel 2: y = x * scale + shift (per-channel affine expanded to the lane axis)
# ----------------------------------------------------------------------------
def _norm_kernel(x_ref, scale_ref, shift_ref, o_ref):
    x = x_ref[...].astype(jnp.float32)
    o_ref[...] = (x * scale_ref[...] + shift_ref[...]).astype(o_ref.dtype)


def _normalize(x2, scale_f, shift_f, *, out_dtype, target_bytes, vmem_phys):
    m1, f = x2.shape
    in_sz = jnp.dtype(x2.dtype).itemsize
    out_sz = jnp.dtype(out_dtype).itemsize
    pack = _sublane_pack(min(in_sz, out_sz))

    tf = _feature_tile(f, max(in_sz, out_sz), pack, target_bytes)
    nf = f // tf
    tm = _row_tile(m1, tf * (in_sz + out_sz), pack, 1, target_bytes)
    nr = pl.cdiv(m1, tm)

    tm_p, tf_p = _ru(tm, 8), _ru(tf, 128)
    blk = tm_p * tf_p
    need = (2 * blk * in_sz + 2 * blk * out_sz + 2 * blk * 4
            + 8 * tf_p * 4 + (2 << 20))

    # Feature axis OUTER: the small (1, tf) scale/shift blocks are only
    # re-fetched when the feature tile changes, not on every row step.
    return pl.pallas_call(
        _norm_kernel,
        out_shape=jax.ShapeDtypeStruct((m1, f), out_dtype),
        grid_spec=pltpu.PrefetchScalarGridSpec(
            num_scalar_prefetch=0,
            grid=(nf, nr),
            in_specs=[pl.BlockSpec((tm, tf), lambda ff, i: (i, ff)),
                      pl.BlockSpec((1, tf), lambda ff, i: (0, ff)),
                      pl.BlockSpec((1, tf), lambda ff, i: (0, ff))],
            out_specs=pl.BlockSpec((tm, tf), lambda ff, i: (i, ff))),
        compiler_params=pltpu.CompilerParams(
            dimension_semantics=("parallel", "parallel"),
            vmem_limit_bytes=_vmem_limit(need, vmem_phys)),
    )(x2, scale_f, shift_f)


# ----------------------------------------------------------------------------
# Kernel 3: fused single-pass BN (stats + normalize) for slabs resident in VMEM.
# ----------------------------------------------------------------------------
def _fused_kernel(x_ref, w_ref, b_ref, o_ref, mean_ref, var_ref, *, eps, inv_cnt):
    x = x_ref[...].astype(jnp.float32)                 # (M1, C, HW)
    s = jnp.sum(x, axis=0, keepdims=True)              # (1, C, HW)  VPU adds
    q = jnp.sum(x * x, axis=0, keepdims=True)
    s = jnp.sum(s, axis=2, keepdims=True)              # (1, C, 1)   lane reduce
    q = jnp.sum(q, axis=2, keepdims=True)
    mean = s * inv_cnt
    var = jnp.maximum(q * inv_cnt - mean * mean, 0.0)
    inv_std = jax.lax.rsqrt(var + eps)
    scale = w_ref[...] * inv_std
    shift = b_ref[...] - mean * scale
    o_ref[...] = (x * scale + shift).astype(o_ref.dtype)
    mean_ref[...] = mean
    var_ref[...] = var


def _fused_bn(x3, weight, bias, *, eps, cnt, vmem_phys, need):
    m1, c, hw = x3.shape
    w3 = weight.astype(jnp.float32).reshape(1, c, 1)
    b3 = bias.astype(jnp.float32).reshape(1, c, 1)
    kern = functools.partial(_fused_kernel, eps=float(eps), inv_cnt=1.0 / cnt)
    y3, mean, var = pl.pallas_call(
        kern,
        out_shape=(jax.ShapeDtypeStruct((m1, c, hw), x3.dtype),
                   jax.ShapeDtypeStruct((1, c, 1), jnp.float32),
                   jax.ShapeDtypeStruct((1, c, 1), jnp.float32)),
        grid_spec=pltpu.PrefetchScalarGridSpec(
            num_scalar_prefetch=0,
            grid=(1,),
            in_specs=[pl.BlockSpec((m1, c, hw), lambda i: (0, 0, 0)),
                      pl.BlockSpec((1, c, 1), lambda i: (0, 0, 0)),
                      pl.BlockSpec((1, c, 1), lambda i: (0, 0, 0))],
            out_specs=(pl.BlockSpec((m1, c, hw), lambda i: (0, 0, 0)),
                       pl.BlockSpec((1, c, 1), lambda i: (0, 0, 0)),
                       pl.BlockSpec((1, c, 1), lambda i: (0, 0, 0)))),
        compiler_params=pltpu.CompilerParams(
            dimension_semantics=("arbitrary",),
            vmem_limit_bytes=_vmem_limit(need, vmem_phys)),
    )(x3, w3, b3)
    return y3, mean.reshape(c), var.reshape(c)


# ----------------------------------------------------------------------------
# Wrapper: myBatchNorm3d spiking forward.
# ----------------------------------------------------------------------------
def my_batchnorm3d(
    x,                      # (T, N, C, H, W)
    weight,                 # (C,)  gamma
    bias,                   # (C,)  beta
    running_mean,           # (C,)
    running_var,            # (C,)
    *,
    eps: float = 1e-5,
    momentum: float = 0.1,
    training: bool = True,
    track_running_stats: bool = True,
    block_target_bytes=None,      # tuning/testing override
    force_two_pass: bool = False, # testing override
):
    """Spiking-mode forward of myBatchNorm3d.  Returns (y, new_rm, new_rv)."""
    # TODO(synk): the non-spiking branch of the module calls an (undefined) plain
    # BatchNorm2d on 4-D input; only the spiking BatchNorm3d path is implemented.
    t, n, c, h, w = x.shape
    m1, hw = t * n, h * w
    f = c * hw
    cnt = float(m1 * hw)

    cores, vmem_phys = _tpu_generation_info()
    if block_target_bytes is None:
        block_target_bytes = (12 << 20) if vmem_phys > (64 << 20) else (6 << 20)

    use_batch_stats = training or (not track_running_stats)

    in_sz = jnp.dtype(x.dtype).itemsize
    padded_elems = m1 * _ru(c, 8) * _ru(hw, 128)       # VMEM-tiled footprint
    fused_need = 4 * padded_elems * in_sz + 3 * padded_elems * 4 + (2 << 20)
    use_fused = (use_batch_stats and not force_two_pass
                 and fused_need <= _vmem_cap(vmem_phys) - (4 << 20))

    if use_fused:
        y3, mean, var = _fused_bn(x.reshape(m1, c, hw), weight, bias,
                                  eps=eps, cnt=cnt, vmem_phys=vmem_phys,
                                  need=fused_need)
        y = y3.reshape(t, n, c, h, w)
    else:
        x2 = x.reshape(m1, f)                           # free contiguous reshape
        if use_batch_stats:
            ssum, ssq = _channel_sums(
                x2, c, hw, target_bytes=block_target_bytes,
                cores=cores, vmem_phys=vmem_phys)
            mean = ssum / cnt
            # E[x^2] - mean^2 in f32 can cancel slightly negative; clamp.
            var = jnp.maximum(ssq / cnt - mean * mean, 0.0)
        else:
            mean = running_mean.astype(jnp.float32)
            var = running_var.astype(jnp.float32)

        # Fold everything into per-channel scale/shift, expanded to the lane axis.
        scale_c = weight.astype(jnp.float32) * jax.lax.rsqrt(var + eps)
        shift_c = bias.astype(jnp.float32) - mean * scale_c
        scale_f = jnp.broadcast_to(scale_c[:, None], (c, hw)).reshape(1, f)
        shift_f = jnp.broadcast_to(shift_c[:, None], (c, hw)).reshape(1, f)

        y2 = _normalize(x2, scale_f, shift_f, out_dtype=x.dtype,
                        target_bytes=block_target_bytes, vmem_phys=vmem_phys)
        y = y2.reshape(t, n, c, h, w)

    if training and track_running_stats:
        unbias = cnt / (cnt - 1.0) if cnt > 1.0 else 1.0
        new_rm = (1.0 - momentum) * running_mean + momentum * mean
        new_rv = (1.0 - momentum) * running_var + momentum * (var * unbias)
    else:
        new_rm, new_rv = running_mean, running_var

    return y, new_rm, new_rv


# ----------------------------------------------------------------------------
# Pure-JAX reference (BatchNorm3d forward on the permuted view).
# ----------------------------------------------------------------------------
def _reference(x, weight, bias, running_mean, running_var, *,
               eps, momentum, training=True):
    c = x.shape[2]
    if training:
        mean = x.mean(axis=(0, 1, 3, 4))
        var = x.var(axis=(0, 1, 3, 4))                 # biased, for normalization
    else:
        mean, var = running_mean, running_var
    rs = lambda v: v.reshape(1, 1, c, 1, 1)
    y = (x - rs(mean)) / jnp.sqrt(rs(var) + eps) * rs(weight) + rs(bias)
    if training:
        n_el = x.shape[0] * x.shape[1] * x.shape[3] * x.shape[4]
        var_unb = var * (n_el / (n_el - 1.0))
        rm = (1.0 - momentum) * running_mean + momentum * mean
        rv = (1.0 - momentum) * running_var + momentum * var_unb
    else:
        rm, rv = running_mean, running_var
    return y, rm, rv


if __name__ == "__main__":
    key = jax.random.PRNGKey(0)
    ks = jax.random.split(key, 6)
    eps, momentum = 1e-5, 0.1

    # ---- Case 1: fused single-pass path (slab resident in VMEM), training ----
    T, N, C, H, W = 4, 2, 4, 16, 16
    x = jax.random.normal(ks[0], (T, N, C, H, W), dtype=jnp.float32)
    weight = 1.0 + 0.1 * jax.random.normal(ks[1], (C,), dtype=jnp.float32)
    bias = 0.05 * jax.random.normal(ks[2], (C,), dtype=jnp.float32)
    rm = jnp.zeros((C,), jnp.float32)
    rv = jnp.ones((C,), jnp.float32)

    y, nrm, nrv = my_batchnorm3d(x, weight, bias, rm, rv,
                                 eps=eps, momentum=momentum, training=True)
    jax.block_until_ready((y, nrm, nrv))
    y_r, rm_r, rv_r = _reference(x, weight, bias, rm, rv,
                                 eps=eps, momentum=momentum, training=True)
    assert y.shape == x.shape and y.dtype == x.dtype
    assert jnp.allclose(y, y_r, atol=1e-4, rtol=1e-4), "fused: output mismatch"
    assert jnp.allclose(nrm, rm_r, atol=1e-5, rtol=1e-5), "fused: running-mean mismatch"
    assert jnp.allclose(nrv, rv_r, atol=1e-5, rtol=1e-5), "fused: running-var mismatch"

    # ---- Case 2: two-pass path, 7x7 spatial (non-128 lanes), ragged rows ----
    # Small block target forces multiple grid steps + the tail-masked reduce block.
    T2, N2, C2, H2, W2 = 9, 3, 8, 7, 7
    x2 = jax.random.normal(ks[3], (T2, N2, C2, H2, W2), dtype=jnp.float32)
    w2 = 1.0 + 0.1 * jax.random.normal(ks[4], (C2,), dtype=jnp.float32)
    b2 = 0.05 * jax.random.normal(ks[5], (C2,), dtype=jnp.float32)
    rm2 = jnp.zeros((C2,), jnp.float32)
    rv2 = jnp.ones((C2,), jnp.float32)

    y2, nrm2, nrv2 = my_batchnorm3d(x2, w2, b2, rm2, rv2,
                                    eps=eps, momentum=momentum, training=True,
                                    force_two_pass=True,
                                    block_target_bytes=32 * 1024)
    jax.block_until_ready((y2, nrm2, nrv2))
    y2_r, rm2_r, rv2_r = _reference(x2, w2, b2, rm2, rv2,
                                    eps=eps, momentum=momentum, training=True)
    assert jnp.allclose(y2, y2_r, atol=1e-4, rtol=1e-4), "two-pass: output mismatch"
    assert jnp.allclose(nrm2, rm2_r, atol=1e-5, rtol=1e-5), "two-pass: running-mean mismatch"
    assert jnp.allclose(nrv2, rv2_r, atol=1e-5, rtol=1e-5), "two-pass: running-var mismatch"

    # ---- Case 3: eval mode (running stats), normalize-only path ----
    y3, nrm3, nrv3 = my_batchnorm3d(x, weight, bias, rm_r, rv_r,
                                    eps=eps, momentum=momentum, training=False)
    jax.block_until_ready(y3)
    y3_r, _, _ = _reference(x, weight, bias, rm_r, rv_r,
                            eps=eps, momentum=momentum, training=False)
    assert jnp.allclose(y3, y3_r, atol=1e-4, rtol=1e-4), "eval: output mismatch"
    assert jnp.allclose(nrm3, rm_r) and jnp.allclose(nrv3, rv_r)

    print("KERNEL_OK")
</pallas_src>

<mosaic_0001>
module attributes {stable_mosaic.version = 11 : i64} {
  func.func @_fused_kernel(%arg0: i32, %arg1: memref<8x4x256xf32, #tpu.memory_space<vmem>>, %arg2: memref<1x4x1xf32, #tpu.memory_space<vmem>>, %arg3: memref<1x4x1xf32, #tpu.memory_space<vmem>>, %arg4: memref<8x4x256xf32, #tpu.memory_space<vmem>>, %arg5: memref<1x4x1xf32, #tpu.memory_space<vmem>>, %arg6: memref<1x4x1xf32, #tpu.memory_space<vmem>>) attributes {dimension_semantics = [#tpu.dimension_semantics<arbitrary>], iteration_bounds = array<i64: 1>, scalar_prefetch = 0 : i64, scratch_operands = 0 : i64, tpu.core_type = #tpu.core_type<tc>, window_params = [{pipeline_mode = #tpu.pipeline_mode<synchronous>, transform_indices = @transform_0, window_bounds = array<i64: 8, 4, 256>}, {pipeline_mode = #tpu.pipeline_mode<synchronous>, transform_indices = @transform_1, window_bounds = array<i64: 1, 4, 1>}, {pipeline_mode = #tpu.pipeline_mode<synchronous>, transform_indices = @transform_2, window_bounds = array<i64: 1, 4, 1>}, {pipeline_mode = #tpu.pipeline_mode<synchronous>, transform_indices = @transform_3, window_bounds = array<i64: 8, 4, 256>}, {pipeline_mode = #tpu.pipeline_mode<synchronous>, transform_indices = @transform_4, window_bounds = array<i64: 1, 4, 1>}, {pipeline_mode = #tpu.pipeline_mode<synchronous>, transform_indices = @transform_5, window_bounds = array<i64: 1, 4, 1>}]} {
    %c0 = arith.constant 0 : index
    %c0_0 = arith.constant 0 : index
    %c0_1 = arith.constant 0 : index
    %0 = vector.load %arg1[%c0, %c0_0, %c0_1] : memref<8x4x256xf32, #tpu.memory_space<vmem>>, vector<8x4x256xf32>
    %cst = arith.constant dense<0.000000e+00> : vector<4x256xf32>
    %1 = vector.multi_reduction <add>, %0, %cst [0] : vector<8x4x256xf32> to vector<4x256xf32>
    %2 = vector.shape_cast %1 : vector<4x256xf32> to vector<1x4x256xf32>
    %3 = arith.mulf %0, %0 : vector<8x4x256xf32>
    %cst_2 = arith.constant dense<0.000000e+00> : vector<4x256xf32>
    %4 = vector.multi_reduction <add>, %3, %cst_2 [0] : vector<8x4x256xf32> to vector<4x256xf32>
    %5 = vector.shape_cast %4 : vector<4x256xf32> to vector<1x4x256xf32>
    %cst_3 = arith.constant dense<0.000000e+00> : vector<1x4xf32>
    %6 = vector.multi_reduction <add>, %2, %cst_3 [2] : vector<1x4x256xf32> to vector<1x4xf32>
    %7 = vector.shape_cast %6 : vector<1x4xf32> to vector<1x4x1xf32>
    %cst_4 = arith.constant dense<0.000000e+00> : vector<1x4xf32>
    %8 = vector.multi_reduction <add>, %5, %cst_4 [2] : vector<1x4x256xf32> to vector<1x4xf32>
    %9 = vector.shape_cast %8 : vector<1x4xf32> to vector<1x4x1xf32>
    %cst_5 = arith.constant 4.8828125E-4 : f32
    %10 = vector.broadcast %cst_5 : f32 to vector<1x4x1xf32>
    %11 = arith.mulf %7, %10 : vector<1x4x1xf32>
    %cst_6 = arith.constant 4.8828125E-4 : f32
    %12 = vector.broadcast %cst_6 : f32 to vector<1x4x1xf32>
    %13 = arith.mulf %9, %12 : vector<1x4x1xf32>
    %14 = arith.mulf %11, %11 : vector<1x4x1xf32>
    %15 = arith.subf %13, %14 : vector<1x4x1xf32>
    %cst_7 = arith.constant 0.000000e+00 : f32
    %16 = vector.broadcast %cst_7 : f32 to vector<1x4x1xf32>
    %17 = arith.maximumf %15, %16 : vector<1x4x1xf32>
    %cst_8 = arith.constant 9.99999974E-6 : f32
    %18 = vector.broadcast %cst_8 : f32 to vector<1x4x1xf32>
    %19 = arith.addf %17, %18 : vector<1x4x1xf32>
    %20 = math.rsqrt %19 : vector<1x4x1xf32>
    %c0_9 = arith.constant 0 : index
    %c0_10 = arith.constant 0 : index
    %c0_11 = arith.constant 0 : index
    %21 = vector.load %arg2[%c0_9, %c0_10, %c0_11] : memref<1x4x1xf32, #tpu.memory_space<vmem>>, vector<1x4x1xf32>
    %22 = arith.mulf %21, %20 : vector<1x4x1xf32>
    %c0_12 = arith.constant 0 : index
    %c0_13 = arith.constant 0 : index
    %c0_14 = arith.constant 0 : index
    %23 = vector.load %arg3[%c0_12, %c0_13, %c0_14] : memref<1x4x1xf32, #tpu.memory_space<vmem>>, vector<1x4x1xf32>
    %24 = arith.mulf %11, %22 : vector<1x4x1xf32>
    %25 = arith.subf %23, %24 : vector<1x4x1xf32>
    %26 = vector.broadcast %22 : vector<1x4x1xf32> to vector<8x4x256xf32>
    %27 = arith.mulf %0, %26 : vector<8x4x256xf32>
    %28 = vector.broadcast %25 : vector<1x4x1xf32> to vector<8x4x256xf32>
    %29 = arith.addf %27, %28 : vector<8x4x256xf32>
    %c0_15 = arith.constant 0 : index
    %c0_16 = arith.constant 0 : index
    %c0_17 = arith.constant 0 : index
    %30 = vector.load %arg4[%c0_15, %c0_16, %c0_17] : memref<8x4x256xf32, #tpu.memory_space<vmem>>, vector<8x4x256xf32>
    tpu.vector_store %arg4[%c0_15, %c0_16, %c0_17], %29 {strides = array<i32>} : memref<8x4x256xf32, #tpu.memory_space<vmem>>, vector<8x4x256xf32>,
    %c0_18 = arith.constant 0 : index
    %c0_19 = arith.constant 0 : index
    %c0_20 = arith.constant 0 : index
    %31 = vector.load %arg5[%c0_18, %c0_19, %c0_20] : memref<1x4x1xf32, #tpu.memory_space<vmem>>, vector<1x4x1xf32>
    tpu.vector_store %arg5[%c0_18, %c0_19, %c0_20], %11 {strides = array<i32>} : memref<1x4x1xf32, #tpu.memory_space<vmem>>, vector<1x4x1xf32>,
    %c0_21 = arith.constant 0 : index
    %c0_22 = arith.constant 0 : index
    %c0_23 = arith.constant 0 : index
    %32 = vector.load %arg6[%c0_21, %c0_22, %c0_23] : memref<1x4x1xf32, #tpu.memory_space<vmem>>, vector<1x4x1xf32>
    tpu.vector_store %arg6[%c0_21, %c0_22, %c0_23], %17 {strides = array<i32>} : memref<1x4x1xf32, #tpu.memory_space<vmem>>, vector<1x4x1xf32>,
    return
  }
  func.func @transform_0(%arg0: i32) -> (i32, i32, i32) {
    %c0_i32 = arith.constant 0 : i32
    %c0_i32_0 = arith.constant 0 : i32
    %c0_i32_1 = arith.constant 0 : i32
    %c0_i32_2 = arith.constant 0 : i32
    return %c0_i32, %c0_i32_0, %c0_i32_1 : i32, i32, i32
  }
  func.func @transform_1(%arg0: i32) -> (i32, i32, i32) {
    %c0_i32 = arith.constant 0 : i32
    %c0_i32_0 = arith.constant 0 : i32
    %c0_i32_1 = arith.constant 0 : i32
    %c0_i32_2 = arith.constant 0 : i32
    return %c0_i32, %c0_i32_0, %c0_i32_1 : i32, i32, i32
  }
  func.func @transform_2(%arg0: i32) -> (i32, i32, i32) {
    %c0_i32 = arith.constant 0 : i32
    %c0_i32_0 = arith.constant 0 : i32
    %c0_i32_1 = arith.constant 0 : i32
    %c0_i32_2 = arith.constant 0 : i32
    return %c0_i32, %c0_i32_0, %c0_i32_1 : i32, i32, i32
  }
  func.func @transform_3(%arg0: i32) -> (i32, i32, i32) {
    %c0_i32 = arith.constant 0 : i32
    %c0_i32_0 = arith.constant 0 : i32
    %c0_i32_1 = arith.constant 0 : i32
    %c0_i32_2 = arith.constant 0 : i32
    return %c0_i32, %c0_i32_0, %c0_i32_1 : i32, i32, i32
  }
  func.func @transform_4(%arg0: i32) -> (i32, i32, i32) {
    %c0_i32 = arith.constant 0 : i32
    %c0_i32_0 = arith.constant 0 : i32
    %c0_i32_1 = arith.constant 0 : i32
    %c0_i32_2 = arith.constant 0 : i32
    return %c0_i32, %c0_i32_0, %c0_i32_1 : i32, i32, i32
  }
  func.func @transform_5(%arg0: i32) -> (i32, i32, i32) {
    %c0_i32 = arith.constant 0 : i32
    %c0_i32_0 = arith.constant 0 : i32
    %c0_i32_1 = arith.constant 0 : i32
    %c0_i32_2 = arith.constant 0 : i32
    return %c0_i32, %c0_i32_0, %c0_i32_1 : i32, i32, i32
  }
}

</mosaic_0001>

<bundles_post_ra>
// kernel: tpu_custom_call.1
= control target key start
LH: loop header
LB: loop body
LE: loop exit
PB: predicated region body
PF: predicated region fallthrough
CT: control target
= control target key end

     0   :  { %11 = vsyncpa [#allocation3], 0  ;;  %s499_s0 = inlined_call_operand.hbm [shape: f32[8,4,256], index: 0, kind: input, shape index: {}]   ;;  %s500_s1 = inlined_call_operand.vmem [shape: f32[1,4,1], index: 1, kind: input, shape index: {}]   ;;  %s501_s2 = inlined_call_operand.vmem [shape: f32[1,4,1], index: 2, kind: input, shape index: {}]   ;;  %s502_s3 = inlined_call_operand.hbm [shape: f32[8,4,256], index: 3, kind: output, shape index: {0}]   ;;  %s503_s4 = inlined_call_operand.vmem [shape: f32[1,4,1], index: 4, kind: output, shape index: {1}]   ;;  %s504_s5 = inlined_call_operand.vmem [shape: f32[1,4,1], index: 5, kind: output, shape index: {2}]  }
   0x1   :  { %12 = vsyncpa [#allocation4], 0  ;;  %s321_s18 = smov [#allocation2]   ;;  %s273_s22 = scalar_lea.hbm %s499_s0, 1024 }
   0x2   :  { %s18_s19 = sshll.u32 %s321_s18, 4  ;;  %p274_p0 = scmp.ne.s32.totalorder %s499_s0, %s273_s22  ;;  %s19_s19 = int_to_ptr.vmem [resolvable:$true] %s18_s19 }
   0x3   :  { %p277_p1 = scmp.lt.u32.totalorder %s273_s22, %s499_s0 }
   0x5   :  { %p279_p2 = pnand %p277_p1, %p274_p0 }
   0x7   :  { %282 = shalt.err (!%p279_p2)
}
   0x8   :  { %s283_s27 = scalar_lea.vmem %s19_s19, 1024  ;;  %p288_p4 = scmp.lt.s32.totalorder %s19_s19, %s19_s19 }
   0x9   :  { %p284_p3 = scmp.ne.s32.totalorder %s19_s19, %s283_s27  ;;  %p289_p5 = scmp.lt.s32.totalorder %s283_s27, %s283_s27 }
   0xb   :  { %p290_p6 = por %p289_p5, %p288_p4 }
   0xd   :  { %p291_p7 = pnand %p290_p6, %p284_p3 }
   0xf   :  { %294 = shalt.err (!%p291_p7)
}
  0x10   :  { %s322_s28 = smov 128   ;;  %s323_s29 = smov 8  }
  0x11   :  { %24 = dma.hbm_to_vmem [thread:$0]  %s499_s0, 1024, %s19_s19, [#allocation3], %s322_s28, %s322_s28, %s323_s29  }
  0x12   :  { %317 = dma.done.wait [#allocation3], 1024  }
  0x13   :  { %318 = vsyncadd [#allocation3], 4294966272  ;;  %vm64_vm0 = vcmask 1043456   ;;  %v372_v0 = vld [vmem:[#allocation2] sm:$0xff]  ;;  %v374_v1 = vld [vmem:[#allocation2 + $0x8] sm:$0xff]  ;;  %vm227_vm1 = vcmask 3072  }
  0x14   :  { %v376_v2 = vld [vmem:[#allocation2 + $0x10] sm:$0xff]  ;;  %v378_v3 = vld [vmem:[#allocation2 + $0x18] sm:$0xff]  ;;  %v48_v4 = vcombine.high %v372_v0, %v372_v0  ;;  %v49_v5 = vcombine.high %v374_v1, %v374_v1  ;;  %v65_v6 = vsel %vm64_vm0, %v372_v0, 0.0  ;;  %v386_v7 = vld [vmem:[#allocation2 + $0x20] sm:$0xff]  ;;  %v66_v9 = vsel %vm64_vm0, %v374_v1, 0.0 }
  0x15   :  { %v50_v8 = vcombine.high %v376_v2, %v376_v2  ;;  %v51_v10 = vcombine.high %v378_v3, %v378_v3  ;;  %v67_v11 = vadd.f32 %v66_v9, %v65_v6  ;;  %v68_v12 = vsel %vm64_vm0, %v376_v2, 0.0  ;;  %v396_v13 = vld [vmem:[#allocation2 + $0x28] sm:$0xff]  ;;  %v398_v14 = vld [vmem:[#allocation2 + $0x30] sm:$0xff]  ;;  %v409_v23 = vld [vmem:[#allocation2 + $0x38] sm:$0xff] }
  0x16   :  { %v70_v15 = vsel %vm64_vm0, %v378_v3, 0.0  ;;  %v52_v16 = vcombine.high %v386_v7, %v386_v7  ;;  %v80_v18 = vsel %vm64_vm0, %v48_v4, 0.0  ;;  %v81_v19 = vsel %vm64_vm0, %v49_v5, 0.0 }
  0x17   :  { %v69_v17 = vadd.f32 %v68_v12, %v67_v11  ;;  %v72_v20 = vsel %vm64_vm0, %v386_v7, 0.0  ;;  %v82_v21 = vadd.f32 %v81_v19, %v80_v18  ;;  %v83_v22 = vsel %vm64_vm0, %v50_v8, 0.0 }
  0x18   :  { %v53_v24 = vcombine.high %v396_v13, %v396_v13  ;;  %v54_v25 = vcombine.high %v398_v14, %v398_v14  ;;  %v85_v27 = vsel %vm64_vm0, %v51_v10, 0.0  ;;  %v74_v28 = vsel %vm64_vm0, %v396_v13, 0.0 }
  0x19   :  { %v71_v26 = vadd.f32 %v70_v15, %v69_v17  ;;  %v84_v29 = vadd.f32 %v83_v22, %v82_v21  ;;  %v95_v30 = vmul.f32 %v372_v0, %v372_v0  ;;  %v96_v31 = vmul.f32 %v374_v1, %v374_v1 }
  0x1a   :  { %v87_v33 = vsel %vm64_vm0, %v52_v16, 0.0  ;;  %v97_v34 = vmul.f32 %v376_v2, %v376_v2  ;;  %v55_v35 = vcombine.high %v409_v23, %v409_v23  ;;  %v76_v36 = vsel %vm64_vm0, %v398_v14, 0.0 }
  0x1b   :  { %v73_v32 = vadd.f32 %v72_v20, %v71_v26  ;;  %v78_v37 = vsel %vm64_vm0, %v409_v23, 0.0  ;;  %v86_v38 = vadd.f32 %v85_v27, %v84_v29  ;;  %v89_v40 = vsel %vm64_vm0, %v53_v24, 0.0 }
  0x1c   :  { %v91_v41 = vsel %vm64_vm0, %v54_v25, 0.0  ;;  %v98_v42 = vmul.f32 %v378_v3, %v378_v3  ;;  %v99_v44 = vmul.f32 %v386_v7, %v386_v7  ;;  %v111_v45 = vcombine.high %v95_v30, %v95_v30 }
  0x1d   :  { %v75_v39 = vadd.f32 %v74_v28, %v73_v32  ;;  %v88_v43 = vadd.f32 %v87_v33, %v86_v38  ;;  %v112_v46 = vcombine.high %v96_v31, %v96_v31  ;;  %v113_v48 = vcombine.high %v97_v34, %v97_v34 }
  0x1e   :  { %v127_v49 = vsel %vm64_vm0, %v95_v30, 0.0  ;;  %v128_v50 = vsel %vm64_vm0, %v96_v31, 0.0  ;;  %v93_v52 = vsel %vm64_vm0, %v55_v35, 0.0  ;;  %v130_v54 = vsel %vm64_vm0, %v97_v34, 0.0 }
  0x1f   :  { %v77_v47 = vadd.f32 %v76_v36, %v75_v39  ;;  %v90_v51 = vadd.f32 %v89_v40, %v88_v43  ;;  %v129_v53 = vadd.f32 %v128_v50, %v127_v49  ;;  %v100_v56 = vmul.f32 %v396_v13, %v396_v13 }
  0x20   :  { %v114_v57 = vcombine.high %v98_v42, %v98_v42  ;;  %v132_v58 = vsel %vm64_vm0, %v98_v42, 0.0  ;;  %v101_v60 = vmul.f32 %v398_v14, %v398_v14  ;;  %v142_v62 = vsel %vm64_vm0, %v111_v45, 0.0 }
  0x21   :  { %v79_v55 = vadd.f32 %v78_v37, %v77_v47  ;;  %v92_v59 = vadd.f32 %v91_v41, %v90_v51  ;;  %v131_v61 = vadd.f32 %v130_v54, %v129_v53  ;;  %v115_v63 = vcombine.high %v99_v44, %v99_v44  ;;  %v174_v51 = vld [vmem:[%s500_s1] sm:$0xf]  ;;  %s326_s1 = smov [#allocation5]  }
  0x22   :  { %v134_v4 = vsel %vm64_vm0, %v99_v44, 0.0  ;;  %v143_v5 = vsel %vm64_vm0, %v112_v46, 0.0  ;;  %v145_v6 = vsel %vm64_vm0, %v113_v48, 0.0  ;;  %v102_v12 = vmul.f32 %v409_v23, %v409_v23  ;;  %v176_v54 = vld [vmem:[%s501_s2] sm:$0xf]  ;;  %s235_s2 = sshll.u32 %s326_s1, 4  ;;  %s236_s2 = int_to_ptr.vmem [resolvable:$true] %s235_s2 }
  0x23   :  { %v94_v8 = vadd.f32 %v93_v52, %v92_v59  ;;  %v157_v9 = vsel %vm64_vm0, %v79_v55, 0.0  ;;  %v133_v10 = vadd.f32 %v132_v58, %v131_v61  ;;  %v144_v11 = vadd.f32 %v143_v5, %v142_v62  ;;  %p300_p9 = scmp.lt.s32.totalorder %s236_s2, %s236_s2 }
  0x24   :  { %v116_v15 = vcombine.high %v100_v56, %v100_v56  ;;  %v136_v16 = vsel %vm64_vm0, %v100_v56, 0.0  ;;  %v147_v17 = vsel %vm64_vm0, %v114_v57, 0.0  ;;  %v117_v22 = vcombine.high %v101_v60, %v101_v60 }
  0x25   :  { %v158_v18 = vsel %vm64_vm0, %v94_v8, 0.0  ;;  %v135_v19 = vadd.f32 %v134_v4, %v133_v10  ;;  %v146_v20 = vadd.f32 %v145_v6, %v144_v11  ;;  %v138_v24 = vsel %vm64_vm0, %v101_v60, 0.0 }
  0x26   :  { %v159_v21 = vadd.f32 %v158_v18, %v157_v9  ;;  %v149_v25 = vsel %vm64_vm0, %v115_v63, 0.0  ;;  %v118_v28 = vcombine.high %v102_v12, %v102_v12  ;;  %v140_v29 = vsel %vm64_vm0, %v102_v12, 0.0 }
  0x27   :  { %v137_v26 = vadd.f32 %v136_v16, %v135_v19  ;;  %v148_v27 = vadd.f32 %v147_v17, %v146_v20  ;;  %v151_v30 = vsel %vm64_vm0, %v116_v15, 0.0  ;;  %v153_v33 = vsel %vm64_vm0, %v117_v22, 0.0 }
  0x28   :  { %160 = vadd.xlane.f32.xlu0 %v159_v21  ;;  %v155_v36 = vsel %vm64_vm0, %v118_v28, 0.0  ;;  %v324_v42 = vmov 0   ;;  %v325_v57 = vmov 839922192   ;;  %v186_v59 = vlaneseq }
  0x29   :  { %v139_v31 = vadd.f32 %v138_v24, %v137_v26  ;;  %v150_v32 = vadd.f32 %v149_v25, %v148_v27  ;;  %261 = vset.pattern.permute.xlu1 %v324_v42  ;;  %262 = vset.pattern.permute.xlu0 %v324_v42  ;;  %v184_v58 = vunpack.c.l.s4 %v325_v57 }
  0x2a   :  { %v187_v61 = vshrl.u32 %v186_v59, 7 }
  0x2b   :  { %v141_v34 = vadd.f32 %v140_v29, %v139_v31  ;;  %v152_v35 = vadd.f32 %v151_v30, %v150_v32  ;;  %v185_v60 = vunpack.c.0.s8 %v184_v58 }
  0x2d   :  { %v154_v37 = vadd.f32 %v153_v33, %v152_v35  ;;  %v162_v39 = vsel %vm64_vm0, %v141_v34, 0.0  ;;  %v188_v62 = vsub.s32 %v185_v60, %v187_v61 }
  0x2f   :  { %v156_v38 = vadd.f32 %v155_v36, %v154_v37 }
  0x31   :  { %v163_v40 = vsel %vm64_vm0, %v156_v38, 0.0 }
  0x32   :  { %v164_v41 = vadd.f32 %v163_v40, %v162_v39 }
  0x34   :  { %165 = vadd.xlane.f32.xlu0 %v164_v41 }
  0xb5   :  { %v161_v43 = vpop.xlane.xlu0 %160 }
  0xb6   :  { %v167_v44 = vmul.f32 0.00048828125, %v161_v43 }
  0xb8   :  { %228 = vst.msk [vmem:[%s503_s4] sm:$0xf] %vm227_vm1, %v167_v44  ;;  %v169_v46 = vmul.f32 %v167_v44, %v167_v44  ;;  %s295_s4 = scalar_lea.vmem %s236_s2, 1024 }
  0xb9   :  { %p296_p8 = scmp.ne.s32.totalorder %s236_s2, %s295_s4  ;;  %p301_p10 = scmp.lt.s32.totalorder %s295_s4, %s295_s4 }
  0xbb   :  { %p302_p11 = por %p301_p10, %p300_p9 }
  0xbd   :  { %p303_p12 = pnand %p302_p11, %p296_p8 }
  0xc1   :  { %v166_v45 = vpop.xlane.xlu0 %165 }
  0xc2   :  { %v168_v47 = vmul.f32 0.00048828125, %v166_v45 }
  0xc4   :  { %v170_v48 = vsub.f32 %v168_v47, %v169_v46 }
  0xc6   :  { %v171_v49 = vmax.f32 %v170_v48, 0.0 }
  0xc8   :  { %v172_v50 = vadd.f32 1e-05, %v171_v49  ;;  %229 = vst.msk [vmem:[%s504_s5] sm:$0xf] %vm227_vm1, %v171_v49 }
  0xca   :  { %271 = vrsqrt.f32 %v172_v50 }
  0xd4   :  { %v272_v52 = vpop.eup %271 }
  0xd5   :  { %v175_v53 = vmul.f32 %v272_v52, %v174_v51 }
  0xd7   :  { %181 = vperm.xlu1 %261, %v175_v53   ;;  %v177_v55 = vmul.f32 %v175_v53, %v167_v44 }
  0xd9   :  { %v178_v56 = vsub.f32 %v176_v54, %v177_v55 }
  0xdb   :  { %201 = vperm.xlu1 %261, %v178_v56  }
 0x156   :  { %v182_v63 = vpop.permute.xlu1 %181 }
 0x157   :  { %v189_v4 = vrot.slane %v182_v63, %v188_v62 }
 0x159   :  { %v191_v6 = vmul.f32 %v189_v4, %v372_v0  ;;  %v192_v9 = vmul.f32 %v189_v4, %v374_v1  ;;  %v193_v10 = vmul.f32 %v189_v4, %v376_v2  ;;  %v194_v11 = vmul.f32 %v189_v4, %v378_v3 }
 0x15a   :  { %v202_v5 = vpop.permute.xlu1 %201  ;;  %v195_v12 = vmul.f32 %v189_v4, %v386_v7  ;;  %v196_v15 = vmul.f32 %v189_v4, %v396_v13  ;;  %v197_v16 = vmul.f32 %v189_v4, %v398_v14  ;;  %v198_v17 = vmul.f32 %v189_v4, %v409_v23 }
 0x15b   :  { %v209_v8 = vrot.slane %v202_v5, %v188_v62 }
 0x15d   :  { %v211_v18 = vadd.f32 %v209_v8, %v191_v6  ;;  %v212_v19 = vadd.f32 %v209_v8, %v192_v9  ;;  %v213_v0 = vadd.f32 %v209_v8, %v193_v10  ;;  %v214_v20 = vadd.f32 %v209_v8, %v194_v11 }
 0x15e   :  { %v215_v21 = vadd.f32 %v209_v8, %v195_v12  ;;  %v216_v1 = vadd.f32 %v209_v8, %v196_v15  ;;  %v217_v22 = vadd.f32 %v209_v8, %v197_v16  ;;  %v218_v2 = vadd.f32 %v209_v8, %v198_v17 }
 0x15f   :  { %219 = vst [vmem:[#allocation5] sm:$0xff] %v211_v18  ;;  %220 = vst [vmem:[#allocation5 + $0x8] sm:$0xff] %v212_v19 }
 0x160   :  { %221 = vst [vmem:[#allocation5 + $0x10] sm:$0xff] %v213_v0  ;;  %222 = vst [vmem:[#allocation5 + $0x18] sm:$0xff] %v214_v20 }
 0x161   :  { %223 = vst [vmem:[#allocation5 + $0x20] sm:$0xff] %v215_v21  ;;  %224 = vst [vmem:[#allocation5 + $0x28] sm:$0xff] %v216_v1 }
 0x162   :  { %225 = vst [vmem:[#allocation5 + $0x30] sm:$0xff] %v217_v22  ;;  %226 = vst [vmem:[#allocation5 + $0x38] sm:$0xff] %v218_v2 }
 0x163   :  { %306 = shalt.err (!%p303_p12)
}
 0x164   :  { %s307_s15 = scalar_lea.hbm %s502_s3, 1024 }
 0x165   :  { %p308_p13 = scmp.ne.s32.totalorder %s502_s3, %s307_s15  ;;  %p311_p0 = scmp.lt.u32.totalorder %s307_s15, %s502_s3 }
 0x167   :  { %p313_p1 = pnand %p311_p0, %p308_p13 }
 0x169   :  { %316 = shalt.err (!%p313_p1)
}
 0x16a   :  { %241 = dma.vmem_to_hbm [thread:$0]  %s236_s2, 1024, %s502_s3, [#allocation4], %s322_s28, %s322_s28, %s323_s29  }
 0x16b   :  { %319 = dma.done.wait [#allocation4], 1024  }
 0x16c   :  { %320 = vsyncadd [#allocation4], 4294966272 }
 0x16d   :  { %253 = vsyncpa [#allocation3], 1 }
 0x16e   :  { %254 = vsyncpa [#allocation4], 1 }

</bundles_post_ra>
